<compile_context>
chip_gen: v5e
topology: v5e:2x2
jax: 0.10.0
libtpu: 0.0.40
codegen_flags: <defaults>
</compile_context>

<pallas_src>
import functools

import jax
import jax.numpy as jnp
from jax.experimental import pallas as pl
from jax.experimental.pallas import tpu as pltpu

_LN_EPS = 1e-5  # torch.nn.LayerNorm default eps.


def _layer_norm(v, eps=_LN_EPS):
    """LayerNorm over the last dim, elementwise_affine=False (biased variance)."""
    mu = jnp.mean(v, axis=-1, keepdims=True)
    var = jnp.mean(jnp.square(v - mu), axis=-1, keepdims=True)
    return (v - mu) * jax.lax.rsqrt(var + eps)


# ------------------------------- Pallas kernel ------------------------------ #

def _ln_gru_cell_kernel(x_ref, h_ref, wx_ref, bx_ref, wh_ref, bh_ref, o_ref, *,
                        hidden_size, mxu_dtype):
    """Fused LayerNormGRUCell step (matches the PyTorch module exactly):

        xt = x  @ Wx + bx                      # (B, 3H)
        ht = hx @ Wh + bh                      # (B, 3H)
        x_new, h_new   = xt[:, 2H:], ht[:, 2H:]
        gates          = sigmoid(LN(xt[:, :2H]) + LN(ht[:, :2H]))
        r, z           = gates[:, :H], gates[:, H:]
        n              = tanh(LN(x_new) + r * LN(h_new))
        h'             = z * hx + (1 - z) * n
    """
    H = hidden_size
    x = x_ref[...]
    h = h_ref[...]
    wx = wx_ref[...]
    wh = wh_ref[...]

    if mxu_dtype is not None:
        # bf16 MXU operands (v6e / v7x win); accumulation stays f32 and all
        # VPU/EUP elementwise math below stays f32 (required on v5e anyway).
        x_mm, h_mm = x.astype(mxu_dtype), h.astype(mxu_dtype)
        wx, wh = wx.astype(mxu_dtype), wh.astype(mxu_dtype)
    else:
        x_mm, h_mm = x, h

    xt = jnp.dot(x_mm, wx, preferred_element_type=jnp.float32) + bx_ref[...]
    ht = jnp.dot(h_mm, wh, preferred_element_type=jnp.float32) + bh_ref[...]

    # With H a multiple of 128 these static slices fall on lane boundaries.
    x_new = xt[:, 2 * H:]
    h_new = ht[:, 2 * H:]
    x_rz = _layer_norm(xt[:, :2 * H])
    h_rz = _layer_norm(ht[:, :2 * H])

    gates = jax.nn.sigmoid(x_rz + h_rz)
    r_t = gates[:, :H]
    z_t = gates[:, H:]
    n_t = jnp.tanh(_layer_norm(x_new) + r_t * _layer_norm(h_new))

    o_ref[...] = (z_t * h + (1.0 - z_t) * n_t).astype(o_ref.dtype)


# ------------------------------ Kernel wrapper ------------------------------ #

def _round_up(n, m):
    return ((n + m - 1) // m) * m


def layer_norm_gru_cell(x, hx, params, *, hidden_size, block_b=256,
                        mxu_dtype=None):
    """x: (B, input_size), hx: (B, H) or None.  Returns (B, H) float32."""
    B, input_size = x.shape
    H = hidden_size
    if hx is None:
        hx = jnp.zeros((B, H), jnp.float32)

    x = x.astype(jnp.float32)
    hx = hx.astype(jnp.float32)

    # Pad the batch to a sublane multiple (8) and pick a batch block that is a
    # multiple of 8 and divides the padded batch, so every grid step sees a
    # full sublane-aligned block.  Padded rows are independent (per-row LN /
    # matmul) and are sliced off at the end.
    block_b = max(8, _round_up(min(block_b, _round_up(B, 8)), 8))
    Bp = _round_up(B, block_b)
    if Bp != B:
        x = jnp.pad(x, ((0, Bp - B), (0, 0)))
        hx = jnp.pad(hx, ((0, Bp - B), (0, 0)))

    kernel = functools.partial(_ln_gru_cell_kernel, hidden_size=H,
                               mxu_dtype=mxu_dtype)

    out = pl.pallas_call(
        kernel,
        out_shape=jax.ShapeDtypeStruct((Bp, H), jnp.float32),
        grid=(Bp // block_b,),
        in_specs=[
            pl.BlockSpec((block_b, input_size), lambda i: (i, 0)),   # x block
            pl.BlockSpec((block_b, H), lambda i: (i, 0)),            # hx block
            pl.BlockSpec((input_size, 3 * H), lambda i: (0, 0)),     # Wx (VMEM-resident)
            pl.BlockSpec((1, 3 * H), lambda i: (0, 0)),              # bx (VMEM-resident)
            pl.BlockSpec((H, 3 * H), lambda i: (0, 0)),              # Wh (VMEM-resident)
            pl.BlockSpec((1, 3 * H), lambda i: (0, 0)),              # bh (VMEM-resident)
        ],
        out_specs=pl.BlockSpec((block_b, H), lambda i: (i, 0)),
        compiler_params=pltpu.CompilerParams(
            # Batch blocks are independent -> megacore sharding on v7x; at the
            # demo size the grid has a single step, so this is free.
            dimension_semantics=("parallel",),
        ),
    )(x, hx, params["wx_t"], params["bx"], params["wh_t"], params["bh"])

    return out[:B]


# ------------------------------ Parameter init ------------------------------ #

def init_params(key, input_size, hidden_size):
    """torch stores Linear weight as (out, in); pre-transpose to (in, out)."""
    H = hidden_size
    k1, k2, k3, k4 = jax.random.split(key, 4)
    si = 1.0 / float(input_size) ** 0.5
    sh = 1.0 / float(H) ** 0.5
    wx = jax.random.uniform(k1, (3 * H, input_size), jnp.float32, -si, si)
    wh = jax.random.uniform(k2, (3 * H, H), jnp.float32, -sh, sh)
    bx = jax.random.uniform(k3, (1, 3 * H), jnp.float32, -si, si)
    bh = jax.random.uniform(k4, (1, 3 * H), jnp.float32, -sh, sh)
    return {"wx_t": wx.T, "bx": bx, "wh_t": wh.T, "bh": bh}


# ------------------------------ Pure-JAX reference --------------------------- #

def layer_norm_gru_cell_ref(x, hx, params, hidden_size):
    H = hidden_size
    if hx is None:
        hx = jnp.zeros((x.shape[0], H), jnp.float32)
    xt = x @ params["wx_t"] + params["bx"]
    ht = hx @ params["wh_t"] + params["bh"]
    x_new, h_new = xt[:, 2 * H:], ht[:, 2 * H:]
    gates = jax.nn.sigmoid(_layer_norm(xt[:, :2 * H]) + _layer_norm(ht[:, :2 * H]))
    r_t, z_t = gates[:, :H], gates[:, H:]
    n_t = jnp.tanh(_layer_norm(x_new) + r_t * _layer_norm(h_new))
    return z_t * hx + (1.0 - z_t) * n_t


# ----------------------------------- main ----------------------------------- #

if __name__ == "__main__":
    # Small shapes consistent with the module: (batch, input) -> (batch, hidden).
    # hidden_size=128 keeps the 3H/2H/H gate slabs lane-aligned (perf feedback).
    B, input_size, hidden_size = 4, 64, 128

    key = jax.random.PRNGKey(0)
    kx, kh, kp = jax.random.split(key, 3)
    x = jax.random.normal(kx, (B, input_size), jnp.float32)
    hx = jax.random.normal(kh, (B, hidden_size), jnp.float32)
    params = init_params(kp, input_size, hidden_size)

    h_t = layer_norm_gru_cell(x, hx, params, hidden_size=hidden_size)
    h_t = jax.block_until_ready(h_t)
    assert h_t.shape == (B, hidden_size)

    ref = layer_norm_gru_cell_ref(x, hx, params, hidden_size)
    max_err = float(jnp.max(jnp.abs(h_t - ref)))
    assert max_err < 1e-4, f"mismatch vs pure-JAX reference: {max_err}"

    print("KERNEL_OK")
</pallas_src>

<mosaic_0001>
module attributes {stable_mosaic.version = 11 : i64} {
  func.func @_ln_gru_cell_kernel(%arg0: i32, %arg1: memref<8x64xf32, #tpu.memory_space<vmem>>, %arg2: memref<8x128xf32, #tpu.memory_space<vmem>>, %arg3: memref<64x384xf32, #tpu.memory_space<vmem>>, %arg4: memref<1x384xf32, #tpu.memory_space<vmem>>, %arg5: memref<128x384xf32, #tpu.memory_space<vmem>>, %arg6: memref<1x384xf32, #tpu.memory_space<vmem>>, %arg7: memref<8x128xf32, #tpu.memory_space<vmem>>) attributes {dimension_semantics = [#tpu.dimension_semantics<parallel>], iteration_bounds = array<i64: 1>, scalar_prefetch = 0 : i64, scratch_operands = 0 : i64, tpu.core_type = #tpu.core_type<tc>, window_params = [{transform_indices = @transform_0, window_bounds = array<i64: 8, 64>}, {transform_indices = @transform_1, window_bounds = array<i64: 8, 128>}, {pipeline_mode = #tpu.pipeline_mode<synchronous>, transform_indices = @transform_2, window_bounds = array<i64: 64, 384>}, {pipeline_mode = #tpu.pipeline_mode<synchronous>, transform_indices = @transform_3, window_bounds = array<i64: 1, 384>}, {pipeline_mode = #tpu.pipeline_mode<synchronous>, transform_indices = @transform_4, window_bounds = array<i64: 128, 384>}, {pipeline_mode = #tpu.pipeline_mode<synchronous>, transform_indices = @transform_5, window_bounds = array<i64: 1, 384>}, {transform_indices = @transform_6, window_bounds = array<i64: 8, 128>}]} {
    %c0 = arith.constant 0 : index
    %c0_0 = arith.constant 0 : index
    %0 = vector.load %arg1[%c0, %c0_0] : memref<8x64xf32, #tpu.memory_space<vmem>>, vector<8x64xf32>
    %c0_1 = arith.constant 0 : index
    %c0_2 = arith.constant 0 : index
    %1 = vector.load %arg2[%c0_1, %c0_2] : memref<8x128xf32, #tpu.memory_space<vmem>>, vector<8x128xf32>
    %c0_3 = arith.constant 0 : index
    %c0_4 = arith.constant 0 : index
    %2 = vector.load %arg3[%c0_3, %c0_4] : memref<64x384xf32, #tpu.memory_space<vmem>>, vector<64x384xf32>
    %c0_5 = arith.constant 0 : index
    %c0_6 = arith.constant 0 : index
    %3 = vector.load %arg5[%c0_5, %c0_6] : memref<128x384xf32, #tpu.memory_space<vmem>>, vector<128x384xf32>
    %cst = arith.constant dense<0.000000e+00> : vector<8x384xf32>
    %4 = tpu.matmul %0, %2, %cst {dimension_numbers = #tpu.dot_dimension_numbers<[1], [0], [0], [1], [0, 0, 1, 1], [], []>} : vector<8x64xf32>, vector<64x384xf32>, vector<8x384xf32> -> vector<8x384xf32>
    %c0_7 = arith.constant 0 : index
    %c0_8 = arith.constant 0 : index
    %5 = vector.load %arg4[%c0_7, %c0_8] : memref<1x384xf32, #tpu.memory_space<vmem>>, vector<1x384xf32>
    %6 = vector.broadcast %5 : vector<1x384xf32> to vector<8x384xf32>
    %7 = arith.addf %4, %6 : vector<8x384xf32>
    %cst_9 = arith.constant dense<0.000000e+00> : vector<8x384xf32>
    %8 = tpu.matmul %1, %3, %cst_9 {dimension_numbers = #tpu.dot_dimension_numbers<[1], [0], [0], [1], [0, 0, 1, 1], [], []>} : vector<8x128xf32>, vector<128x384xf32>, vector<8x384xf32> -> vector<8x384xf32>
    %c0_10 = arith.constant 0 : index
    %c0_11 = arith.constant 0 : index
    %9 = vector.load %arg6[%c0_10, %c0_11] : memref<1x384xf32, #tpu.memory_space<vmem>>, vector<1x384xf32>
    %10 = vector.broadcast %9 : vector<1x384xf32> to vector<8x384xf32>
    %11 = arith.addf %8, %10 : vector<8x384xf32>
    %12 = vector.extract_strided_slice %7 {offsets = [0, 256], sizes = [8, 128], strides = [1, 1]} : vector<8x384xf32> to vector<8x128xf32>
    %13 = vector.extract_strided_slice %11 {offsets = [0, 256], sizes = [8, 128], strides = [1, 1]} : vector<8x384xf32> to vector<8x128xf32>
    %14 = vector.extract_strided_slice %7 {offsets = [0, 0], sizes = [8, 256], strides = [1, 1]} : vector<8x384xf32> to vector<8x256xf32>
    %cst_12 = arith.constant dense<0.000000e+00> : vector<8xf32>
    %15 = vector.multi_reduction <add>, %14, %cst_12 [1] : vector<8x256xf32> to vector<8xf32>
    %16 = vector.shape_cast %15 : vector<8xf32> to vector<8x1xf32>
    %cst_13 = arith.constant 2.560000e+02 : f32
    %17 = vector.broadcast %cst_13 : f32 to vector<8x1xf32>
    %18 = arith.divf %16, %17 : vector<8x1xf32>
    %19 = vector.broadcast %18 : vector<8x1xf32> to vector<8x256xf32>
    %20 = arith.subf %14, %19 : vector<8x256xf32>
    %21 = arith.mulf %20, %20 : vector<8x256xf32>
    %cst_14 = arith.constant dense<0.000000e+00> : vector<8xf32>
    %22 = vector.multi_reduction <add>, %21, %cst_14 [1] : vector<8x256xf32> to vector<8xf32>
    %23 = vector.shape_cast %22 : vector<8xf32> to vector<8x1xf32>
    %cst_15 = arith.constant 2.560000e+02 : f32
    %24 = vector.broadcast %cst_15 : f32 to vector<8x1xf32>
    %25 = arith.divf %23, %24 : vector<8x1xf32>
    %26 = vector.broadcast %18 : vector<8x1xf32> to vector<8x256xf32>
    %27 = arith.subf %14, %26 : vector<8x256xf32>
    %cst_16 = arith.constant 9.99999974E-6 : f32
    %28 = vector.broadcast %cst_16 : f32 to vector<8x1xf32>
    %29 = arith.addf %25, %28 : vector<8x1xf32>
    %30 = math.rsqrt %29 : vector<8x1xf32>
    %31 = vector.broadcast %30 : vector<8x1xf32> to vector<8x256xf32>
    %32 = arith.mulf %27, %31 : vector<8x256xf32>
    %33 = vector.extract_strided_slice %11 {offsets = [0, 0], sizes = [8, 256], strides = [1, 1]} : vector<8x384xf32> to vector<8x256xf32>
    %cst_17 = arith.constant dense<0.000000e+00> : vector<8xf32>
    %34 = vector.multi_reduction <add>, %33, %cst_17 [1] : vector<8x256xf32> to vector<8xf32>
    %35 = vector.shape_cast %34 : vector<8xf32> to vector<8x1xf32>
    %cst_18 = arith.constant 2.560000e+02 : f32
    %36 = vector.broadcast %cst_18 : f32 to vector<8x1xf32>
    %37 = arith.divf %35, %36 : vector<8x1xf32>
    %38 = vector.broadcast %37 : vector<8x1xf32> to vector<8x256xf32>
    %39 = arith.subf %33, %38 : vector<8x256xf32>
    %40 = arith.mulf %39, %39 : vector<8x256xf32>
    %cst_19 = arith.constant dense<0.000000e+00> : vector<8xf32>
    %41 = vector.multi_reduction <add>, %40, %cst_19 [1] : vector<8x256xf32> to vector<8xf32>
    %42 = vector.shape_cast %41 : vector<8xf32> to vector<8x1xf32>
    %cst_20 = arith.constant 2.560000e+02 : f32
    %43 = vector.broadcast %cst_20 : f32 to vector<8x1xf32>
    %44 = arith.divf %42, %43 : vector<8x1xf32>
    %45 = vector.broadcast %37 : vector<8x1xf32> to vector<8x256xf32>
    %46 = arith.subf %33, %45 : vector<8x256xf32>
    %cst_21 = arith.constant 9.99999974E-6 : f32
    %47 = vector.broadcast %cst_21 : f32 to vector<8x1xf32>
    %48 = arith.addf %44, %47 : vector<8x1xf32>
    %49 = math.rsqrt %48 : vector<8x1xf32>
    %50 = vector.broadcast %49 : vector<8x1xf32> to vector<8x256xf32>
    %51 = arith.mulf %46, %50 : vector<8x256xf32>
    %52 = arith.addf %32, %51 : vector<8x256xf32>
    %53 = arith.negf %52 : vector<8x256xf32>
    %54 = math.exp %53 : vector<8x256xf32>
    %cst_22 = arith.constant 1.000000e+00 : f32
    %55 = vector.broadcast %cst_22 : f32 to vector<8x256xf32>
    %56 = arith.addf %55, %54 : vector<8x256xf32>
    %57 = arith.divf %55, %56 : vector<8x256xf32>
    %58 = vector.extract_strided_slice %57 {offsets = [0, 0], sizes = [8, 128], strides = [1, 1]} : vector<8x256xf32> to vector<8x128xf32>
    %59 = vector.extract_strided_slice %57 {offsets = [0, 128], sizes = [8, 128], strides = [1, 1]} : vector<8x256xf32> to vector<8x128xf32>
    %cst_23 = arith.constant dense<0.000000e+00> : vector<8xf32>
    %60 = vector.multi_reduction <add>, %12, %cst_23 [1] : vector<8x128xf32> to vector<8xf32>
    %61 = vector.shape_cast %60 : vector<8xf32> to vector<8x1xf32>
    %cst_24 = arith.constant 1.280000e+02 : f32
    %62 = vector.broadcast %cst_24 : f32 to vector<8x1xf32>
    %63 = arith.divf %61, %62 : vector<8x1xf32>
    %64 = vector.broadcast %63 : vector<8x1xf32> to vector<8x128xf32>
    %65 = arith.subf %12, %64 : vector<8x128xf32>
    %66 = arith.mulf %65, %65 : vector<8x128xf32>
    %cst_25 = arith.constant dense<0.000000e+00> : vector<8xf32>
    %67 = vector.multi_reduction <add>, %66, %cst_25 [1] : vector<8x128xf32> to vector<8xf32>
    %68 = vector.shape_cast %67 : vector<8xf32> to vector<8x1xf32>
    %cst_26 = arith.constant 1.280000e+02 : f32
    %69 = vector.broadcast %cst_26 : f32 to vector<8x1xf32>
    %70 = arith.divf %68, %69 : vector<8x1xf32>
    %71 = vector.broadcast %63 : vector<8x1xf32> to vector<8x128xf32>
    %72 = arith.subf %12, %71 : vector<8x128xf32>
    %cst_27 = arith.constant 9.99999974E-6 : f32
    %73 = vector.broadcast %cst_27 : f32 to vector<8x1xf32>
    %74 = arith.addf %70, %73 : vector<8x1xf32>
    %75 = math.rsqrt %74 : vector<8x1xf32>
    %76 = vector.broadcast %75 : vector<8x1xf32> to vector<8x128xf32>
    %77 = arith.mulf %72, %76 : vector<8x128xf32>
    %cst_28 = arith.constant dense<0.000000e+00> : vector<8xf32>
    %78 = vector.multi_reduction <add>, %13, %cst_28 [1] : vector<8x128xf32> to vector<8xf32>
    %79 = vector.shape_cast %78 : vector<8xf32> to vector<8x1xf32>
    %cst_29 = arith.constant 1.280000e+02 : f32
    %80 = vector.broadcast %cst_29 : f32 to vector<8x1xf32>
    %81 = arith.divf %79, %80 : vector<8x1xf32>
    %82 = vector.broadcast %81 : vector<8x1xf32> to vector<8x128xf32>
    %83 = arith.subf %13, %82 : vector<8x128xf32>
    %84 = arith.mulf %83, %83 : vector<8x128xf32>
    %cst_30 = arith.constant dense<0.000000e+00> : vector<8xf32>
    %85 = vector.multi_reduction <add>, %84, %cst_30 [1] : vector<8x128xf32> to vector<8xf32>
    %86 = vector.shape_cast %85 : vector<8xf32> to vector<8x1xf32>
    %cst_31 = arith.constant 1.280000e+02 : f32
    %87 = vector.broadcast %cst_31 : f32 to vector<8x1xf32>
    %88 = arith.divf %86, %87 : vector<8x1xf32>
    %89 = vector.broadcast %81 : vector<8x1xf32> to vector<8x128xf32>
    %90 = arith.subf %13, %89 : vector<8x128xf32>
    %cst_32 = arith.constant 9.99999974E-6 : f32
    %91 = vector.broadcast %cst_32 : f32 to vector<8x1xf32>
    %92 = arith.addf %88, %91 : vector<8x1xf32>
    %93 = math.rsqrt %92 : vector<8x1xf32>
    %94 = vector.broadcast %93 : vector<8x1xf32> to vector<8x128xf32>
    %95 = arith.mulf %90, %94 : vector<8x128xf32>
    %96 = arith.mulf %58, %95 : vector<8x128xf32>
    %97 = arith.addf %77, %96 : vector<8x128xf32>
    %98 = math.tanh %97 : vector<8x128xf32>
    %99 = arith.mulf %59, %1 : vector<8x128xf32>
    %cst_33 = arith.constant 1.000000e+00 : f32
    %100 = vector.broadcast %cst_33 : f32 to vector<8x128xf32>
    %101 = arith.subf %100, %59 : vector<8x128xf32>
    %102 = arith.mulf %101, %98 : vector<8x128xf32>
    %103 = arith.addf %99, %102 : vector<8x128xf32>
    %c0_34 = arith.constant 0 : index
    %c0_35 = arith.constant 0 : index
    %104 = vector.load %arg7[%c0_34, %c0_35] : memref<8x128xf32, #tpu.memory_space<vmem>>, vector<8x128xf32>
    tpu.vector_store %arg7[%c0_34, %c0_35], %103 {strides = array<i32>} : memref<8x128xf32, #tpu.memory_space<vmem>>, vector<8x128xf32>,
    return
  }
  func.func @transform_0(%arg0: i32) -> (i32, i32) {
    %c0_i32 = arith.constant 0 : i32
    %c0_i32_0 = arith.constant 0 : i32
    return %arg0, %c0_i32 : i32, i32
  }
  func.func @transform_1(%arg0: i32) -> (i32, i32) {
    %c0_i32 = arith.constant 0 : i32
    %c0_i32_0 = arith.constant 0 : i32
    return %arg0, %c0_i32 : i32, i32
  }
  func.func @transform_2(%arg0: i32) -> (i32, i32) {
    %c0_i32 = arith.constant 0 : i32
    %c0_i32_0 = arith.constant 0 : i32
    %c0_i32_1 = arith.constant 0 : i32
    return %c0_i32, %c0_i32_0 : i32, i32
  }
  func.func @transform_3(%arg0: i32) -> (i32, i32) {
    %c0_i32 = arith.constant 0 : i32
    %c0_i32_0 = arith.constant 0 : i32
    %c0_i32_1 = arith.constant 0 : i32
    return %c0_i32, %c0_i32_0 : i32, i32
  }
  func.func @transform_4(%arg0: i32) -> (i32, i32) {
    %c0_i32 = arith.constant 0 : i32
    %c0_i32_0 = arith.constant 0 : i32
    %c0_i32_1 = arith.constant 0 : i32
    return %c0_i32, %c0_i32_0 : i32, i32
  }
  func.func @transform_5(%arg0: i32) -> (i32, i32) {
    %c0_i32 = arith.constant 0 : i32
    %c0_i32_0 = arith.constant 0 : i32
    %c0_i32_1 = arith.constant 0 : i32
    return %c0_i32, %c0_i32_0 : i32, i32
  }
  func.func @transform_6(%arg0: i32) -> (i32, i32) {
    %c0_i32 = arith.constant 0 : i32
    %c0_i32_0 = arith.constant 0 : i32
    return %arg0, %c0_i32 : i32, i32
  }
}

</mosaic_0001>

<bundles_post_ra>
// kernel: tpu_custom_call.1
= control target key start
LH: loop header
LB: loop body
LE: loop exit
PB: predicated region body
PF: predicated region fallthrough
CT: control target
= control target key end

     0   :  { %11 = vsyncpa [#allocation3], 0  ;;  %s770_s0 = inlined_call_operand.hbm [shape: f32[8,64], index: 0, kind: input, shape index: {}]   ;;  %s771_s1 = inlined_call_operand.hbm [shape: f32[8,128], index: 1, kind: input, shape index: {}]   ;;  %s772_s2 = inlined_call_operand.hbm [shape: f32[64,384], index: 2, kind: input, shape index: {}]   ;;  %s773_s3 = inlined_call_operand.hbm [shape: f32[1,384], index: 3, kind: input, shape index: {}]   ;;  %s774_s4 = inlined_call_operand.hbm [shape: f32[128,384], index: 4, kind: input, shape index: {}]   ;;  %s775_s5 = inlined_call_operand.vmem [shape: f32[1,384], index: 5, kind: input, shape index: {}]   ;;  %s776_s6 = inlined_call_operand.hbm [shape: f32[8,128], index: 6, kind: output, shape index: {}]  }
   0x1   :  { %12 = vsyncpa [#allocation6], 0 }
   0x2   :  { %13 = vsyncpa [#allocation9], 0  ;;  %s31_s23 = sshll.u32 %s771_s1, 4  ;;  %s32_s23 = int_to_ptr.hbm [resolvable:$true] %s31_s23 }
   0x3   :  { %14 = vsyncpa [#allocation4], 0  ;;  %s670_s24 = smov [#allocation5]   ;;  %s55_s28 = sshll.u32 %s773_s3, 4  ;;  %s56_s28 = int_to_ptr.hbm [resolvable:$true] %s55_s28 }
   0x4   :  { %s33_s25 = sshll.u32 %s670_s24, 4  ;;  %s671_s29 = smov [#allocation8]   ;;  %s34_s25 = int_to_ptr.vmem [resolvable:$true] %s33_s25 }
   0x5   :  { %36 = dma.hbm_to_vmem [thread:$0]  %s32_s23, 128, %s34_s25, [#allocation6]  }
   0x6   :  { %s57_s30 = sshll.u32 %s671_s29, 4  ;;  %s20_s9 = sshll.u32 %s770_s0, 4  ;;  %s58_s30 = int_to_ptr.vmem [resolvable:$true] %s57_s30  ;;  %s21_s9 = int_to_ptr.hbm [resolvable:$true] %s20_s9 }
   0x7   :  { %60 = dma.hbm_to_vmem [thread:$0]  %s56_s28, 48, %s58_s30, [#allocation9]  }
   0x8   :  { %s41_s11 = sshll.u32 %s772_s2, 4  ;;  %s672_s12 = smov [#allocation2]   ;;  %s42_s11 = int_to_ptr.hbm [resolvable:$true] %s41_s11 }
   0x9   :  { %s22_s13 = sshll.u32 %s672_s12, 4  ;;  %s673_s3 = smov [#allocation7]   ;;  %s23_s13 = int_to_ptr.vmem [resolvable:$true] %s22_s13 }
   0xa   :  { %25 = dma.hbm_to_vmem [thread:$0]  %s21_s9, 128, %s23_s13, [#allocation3]  }
   0xb   :  { %s43_s14 = sshll.u32 %s673_s3, 4  ;;  %s674_s15 = smov 384   ;;  %s44_s14 = int_to_ptr.vmem [resolvable:$true] %s43_s14 }
   0xc   :  { %s675_s16 = smov 24   ;;  %s65_s18 = sshll.u32 %s774_s4, 4  ;;  %s66_s18 = int_to_ptr.hbm [resolvable:$true] %s65_s18 }
   0xd   :  { %49 = dma.hbm_to_vmem [thread:$0]  %s42_s11, 3072, %s44_s14, [#allocation6], %s674_s15, %s674_s15, %s675_s16  }
   0xe   :  { %s676_s19 = smov [#allocation10]  }
   0xf   :  { %s67_s20 = sshll.u32 %s676_s19, 4  ;;  %s68_s20 = int_to_ptr.vmem [resolvable:$true] %s67_s20 }
  0x10   :  { %73 = dma.hbm_to_vmem [thread:$0]  %s66_s18, 6144, %s68_s20, [#allocation9], %s674_s15, %s674_s15, %s675_s16  }
  0x11   :  { %662 = dma.done.wait [#allocation3], 128  }
  0x12   :  { %663 = vsyncadd [#allocation3], 4294967168 }
  0x13   :  { %664 = dma.done.wait [#allocation6], 3200  }
  0x14   :  { %665 = vsyncadd [#allocation6], 4294964096 }
  0x15   :  { %666 = dma.done.wait [#allocation9], 6192  }
  0x16   :  { %667 = vsyncadd [#allocation9], 4294961104  ;;  %v119_v0 = vld [vmem:[#allocation7 + $0xa8] sm:$0xff]  ;;  %v120_v1 = vld [vmem:[#allocation7 + $0xb0] sm:$0xff]  ;;  %vm178_vm0 = vcmask 523264   ;;  %s469_s24 = sshll.u32 %s776_s6, 4  ;;  %s470_s24 = int_to_ptr.hbm [resolvable:$true] %s469_s24 }
  0x17   :  { %v167_v2 = vld [vmem:[#allocation10 + $0x168] sm:$0xff]  ;;  %190 = vmatpush.msra.mxu2 %v119_v0  ;;  %210 = vmatpush.msra.mxu1 %v120_v1  ;;  %v117_v4 = vld [vmem:[#allocation7 + $0x98] sm:$0xff]  ;;  %v114_v7 = vld [vmem:[#allocation7 + $0x80] sm:$0xff] }
  0x18   :  { %v116_v3 = vld [vmem:[#allocation7 + $0x90] sm:$0xff]  ;;  %250 = vmatpush.msra.mxu3 %v167_v2  ;;  %v113_v6 = vld [vmem:[#allocation7 + $0x78] sm:$0xff]  ;;  %v110_v9 = vld [vmem:[#allocation7 + $0x60] sm:$0xff] }
  0x19   :  { %v164_v5 = vld [vmem:[#allocation10 + $0x150] sm:$0xff]  ;;  %191 = vmatpush.msra.mxu2 %v116_v3  ;;  %211 = vmatpush.msra.mxu1 %v117_v4  ;;  %v161_v8 = vld [vmem:[#allocation10 + $0x138] sm:$0xff]  ;;  %v111_v10 = vld [vmem:[#allocation7 + $0x68] sm:$0xff] }
  0x1a   :  { %251 = vmatpush.msra.mxu3 %v164_v5  ;;  %v168_v11 = vld [vmem:[#allocation10 + $0x170] sm:$0xff]  ;;  %v158_v12 = vld [vmem:[#allocation10 + $0x120] sm:$0xff]  ;;  %v165_v13 = vld [vmem:[#allocation10 + $0x158] sm:$0xff] }
  0x1b   :  { %192 = vmatpush.msra.mxu2 %v113_v6  ;;  %212 = vmatpush.msra.mxu1 %v114_v7  ;;  %v107_v14 = vld [vmem:[#allocation7 + $0x48] sm:$0xff]  ;;  %v108_v15 = vld [vmem:[#allocation7 + $0x50] sm:$0xff]  ;;  %v105_v19 = vld [vmem:[#allocation7 + $0x38] sm:$0xff] }
  0x1c   :  { %252 = vmatpush.msra.mxu3 %v161_v8  ;;  %270 = vmatpush.msra.mxu0 %v168_v11  ;;  %v155_v16 = vld [vmem:[#allocation10 + $0x108] sm:$0xff]  ;;  %v162_v17 = vld [vmem:[#allocation10 + $0x140] sm:$0xff]  ;;  %v152_v20 = vld [vmem:[#allocation10 + $0xf0] sm:$0xff] }
  0x1d   :  { %193 = vmatpush.msra.mxu2 %v110_v9  ;;  %213 = vmatpush.msra.mxu1 %v111_v10  ;;  %v104_v18 = vld [vmem:[#allocation7 + $0x30] sm:$0xff]  ;;  %v101_v22 = vld [vmem:[#allocation7 + $0x18] sm:$0xff]  ;;  %v102_v23 = vld [vmem:[#allocation7 + $0x20] sm:$0xff] }
  0x1e   :  { %253 = vmatpush.msra.mxu3 %v158_v12  ;;  %271 = vmatpush.msra.mxu0 %v165_v13  ;;  %v159_v21 = vld [vmem:[#allocation10 + $0x128] sm:$0xff]  ;;  %v149_v24 = vld [vmem:[#allocation10 + $0xd8] sm:$0xff]  ;;  %v156_v25 = vld [vmem:[#allocation10 + $0x110] sm:$0xff] }
  0x1f   :  { %194 = vmatpush.msra.mxu2 %v107_v14  ;;  %214 = vmatpush.msra.mxu1 %v108_v15  ;;  %v98_v26 = vld [vmem:[#allocation7] sm:$0xff]  ;;  %v99_v27 = vld [vmem:[#allocation7 + $0x8] sm:$0xff]  ;;  %v730_v29 = vld [vmem:[#allocation2] sm:$0xff] }
  0x20   :  { %254 = vmatpush.msra.mxu3 %v155_v16  ;;  %272 = vmatpush.msra.mxu0 %v162_v17  ;;  %v146_v28 = vld [vmem:[#allocation10 + $0xc0] sm:$0xff]  ;;  %v169_v30 = vld [vmem:[#allocation10 + $0x178] sm:$0xff]  ;;  %v143_v32 = vld [vmem:[#allocation10 + $0xa8] sm:$0xff] }
  0x21   :  { %195 = vmatpush.msra.mxu2 %v104_v18  ;;  %215 = vmatpush.msra.mxu1 %v105_v19  ;;  %v153_v31 = vld [vmem:[#allocation10 + $0xf8] sm:$0xff]  ;;  %v166_v33 = vld [vmem:[#allocation10 + $0x160] sm:$0xff]  ;;  %v140_v35 = vld [vmem:[#allocation10 + $0x90] sm:$0xff] }
  0x22   :  { %255 = vmatpush.msra.mxu3 %v152_v20  ;;  %273 = vmatpush.msra.mxu0 %v159_v21  ;;  %v150_v34 = vld [vmem:[#allocation10 + $0xe0] sm:$0xff]  ;;  %v163_v36 = vld [vmem:[#allocation10 + $0x148] sm:$0xff]  ;;  %v137_v38 = vld [vmem:[#allocation10 + $0x78] sm:$0xff] }
  0x23   :  { %196 = vmatpush.msra.mxu2 %v101_v22  ;;  %216 = vmatpush.msra.mxu1 %v102_v23  ;;  %v147_v37 = vld [vmem:[#allocation10 + $0xc8] sm:$0xff]  ;;  %v121_v39 = vld [vmem:[#allocation7 + $0xb8] sm:$0xff]  ;;  %v118_v42 = vld [vmem:[#allocation7 + $0xa0] sm:$0xff] }
  0x24   :  { %256 = vmatpush.msra.mxu3 %v149_v24  ;;  %274 = vmatpush.msra.mxu0 %v156_v25  ;;  %v160_v40 = vld [vmem:[#allocation10 + $0x130] sm:$0xff]  ;;  %v134_v43 = vld [vmem:[#allocation10 + $0x60] sm:$0xff]  ;;  %v157_v45 = vld [vmem:[#allocation10 + $0x118] sm:$0xff] }
  0x25   :  { %197 = vmatpush.msra.mxu2 %v98_v26  ;;  %217 = vmatpush.msra.mxu1 %v99_v27  ;;  %v144_v41 = vld [vmem:[#allocation10 + $0xb0] sm:$0xff]  ;;  %v115_v44 = vld [vmem:[#allocation7 + $0x88] sm:$0xff]  ;;  %v141_v46 = vld [vmem:[#allocation10 + $0x98] sm:$0xff] }
  0x26   :  { %257 = vmatpush.msra.mxu3 %v146_v28  ;;  %481 = vmatmul.msk.f32.vlgmr.msra.gmra.mxu2 %vm178_vm0, %v730_v29  ;;  %v131_v47 = vld [vmem:[#allocation10 + $0x48] sm:$0xff]  ;;  %v154_v49 = vld [vmem:[#allocation10 + $0x100] sm:$0xff]  ;;  %v128_v51 = vld [vmem:[#allocation10 + $0x30] sm:$0xff] }
  0x27   :  { %290 = vmatpush.msrb.mxu1 %v169_v30  ;;  %275 = vmatpush.msra.mxu0 %v153_v31  ;;  %v112_v48 = vld [vmem:[#allocation7 + $0x70] sm:$0xff]  ;;  %v138_v50 = vld [vmem:[#allocation10 + $0x80] sm:$0xff]  ;;  %v109_v52 = vld [vmem:[#allocation7 + $0x58] sm:$0xff] }
  0x28   :  { %258 = vmatpush.msra.mxu3 %v143_v32  ;;  %482 = vmatmul.msk.f32.vlgmr.msra.gmra.mxu1 %vm178_vm0, %v730_v29  ;;  %v151_v53 = vld [vmem:[#allocation10 + $0xe8] sm:$0xff]  ;;  %v125_v55 = vld [vmem:[#allocation10 + $0x18] sm:$0xff]  ;;  %v148_v57 = vld [vmem:[#allocation10 + $0xd0] sm:$0xff]  ;;  %v677_v32 = vmov 256.0  }
  0x29   :  { %291 = vmatpush.msrb.mxu1 %v166_v33  ;;  %276 = vmatpush.msra.mxu0 %v150_v34  ;;  %v135_v54 = vld [vmem:[#allocation10 + $0x68] sm:$0xff]  ;;  %v106_v56 = vld [vmem:[#allocation7 + $0x40] sm:$0xff]  ;;  %v132_v58 = vld [vmem:[#allocation10 + $0x50] sm:$0xff]  ;;  %496 = vrcp.f32 %v677_v32 }
  0x2a   :  { %259 = vmatpush.msra.mxu3 %v140_v35  ;;  %230 = vmatpush.msrb.mxu2 %v121_v39  ;;  %v122_v59 = vld [vmem:[#allocation10] sm:$0xff]  ;;  %v736_v61 = vld [vmem:[#allocation5] sm:$0xff]  ;;  %v100_v0 = vld [vmem:[#allocation7 + $0x10] sm:$0xff] }
  0x2b   :  { %292 = vmatpush.msrb.mxu1 %v163_v36  ;;  %277 = vmatpush.msra.mxu0 %v147_v37  ;;  %v103_v60 = vld [vmem:[#allocation7 + $0x28] sm:$0xff]  ;;  %v145_v62 = vld [vmem:[#allocation10 + $0xb8] sm:$0xff]  ;;  %v136_v5 = vld [vmem:[#allocation10 + $0x70] sm:$0xff] }
  0x2c   :  { %260 = vmatpush.msra.mxu3 %v137_v38  ;;  %231 = vmatpush.msrb.mxu2 %v118_v42  ;;  %v129_v63 = vld [vmem:[#allocation10 + $0x38] sm:$0xff]  ;;  %v142_v1 = vld [vmem:[#allocation10 + $0xa0] sm:$0xff]  ;;  %v139_v3 = vld [vmem:[#allocation10 + $0x88] sm:$0xff]  ;;  %v678_v38 = vmov 128.0  }
  0x2d   :  { %293 = vmatpush.msrb.mxu1 %v160_v40  ;;  %278 = vmatpush.msra.mxu0 %v144_v41  ;;  %v126_v2 = vld [vmem:[#allocation10 + $0x20] sm:$0xff]  ;;  %v123_v4 = vld [vmem:[#allocation10 + $0x8] sm:$0xff]  ;;  %v133_v6 = vld [vmem:[#allocation10 + $0x58] sm:$0xff]  ;;  %498 = vrcp.f32 %v678_v38 }
  0x2e   :  { %261 = vmatpush.msra.mxu3 %v134_v43  ;;  %232 = vmatpush.msrb.mxu2 %v115_v44  ;;  %v130_v7 = vld [vmem:[#allocation10 + $0x40] sm:$0xff]  ;;  %v127_v8 = vld [vmem:[#allocation10 + $0x28] sm:$0xff]  ;;  %v124_v9 = vld [vmem:[#allocation10 + $0x10] sm:$0xff] }
  0x2f   :  { %294 = vmatpush.msrb.mxu1 %v157_v45  ;;  %279 = vmatpush.msra.mxu0 %v141_v46  ;;  %v170_v10 = vld [vmem:[#allocation8] sm:$0x7]  ;;  %v242_v18 = vld [vmem:[%s775_s5] sm:$0x7]  ;;  %v497_v33 = vpop.eup %496  ;;  %s679_s5 = smov [#allocation11]  }
  0x30   :  { %262 = vmatpush.msra.mxu3 %v131_v47  ;;  %233 = vmatpush.msrb.mxu2 %v112_v48  ;;  %v173_v11 = vperm.slane %v170_v10, 1  ;;  %v172_v13 = vperm.slane %v170_v10, 0  ;;  %v244_v19 = vperm.slane %v242_v18, 0  ;;  %v245_v20 = vperm.slane %v242_v18, 1  ;;  %s467_s21 = sshll.u32 %s679_s5, 4  ;;  %s468_s21 = int_to_ptr.vmem [resolvable:$true] %s467_s21 }
  0x31   :  { %295 = vmatpush.msrb.mxu1 %v154_v49  ;;  %280 = vmatpush.msra.mxu0 %v138_v50  ;;  %v246_v26 = vperm.slane %v242_v18, 2  ;;  %v314_v34 = vmul.f32 256.0, %v497_v33  ;;  %vm318_vm1 = vweird.f32 %v497_v33 }
  0x32   :  { %263 = vmatpush.msra.mxu3 %v128_v51  ;;  %234 = vmatpush.msrb.mxu2 %v109_v52 }
  0x33   :  { %296 = vmatpush.msrb.mxu1 %v151_v53  ;;  %281 = vmatpush.msra.mxu0 %v135_v54  ;;  %v315_v35 = vsub.f32 1.0, %v314_v34  ;;  %v499_v42 = vpop.eup %498 }
  0x34   :  { %264 = vmatpush.msra.mxu3 %v125_v55  ;;  %235 = vmatpush.msrb.mxu2 %v106_v56  ;;  %v410_v47 = vmul.f32 128.0, %v499_v42  ;;  %vm414_vm2 = vweird.f32 %v499_v42 }
  0x35   :  { %297 = vmatpush.msrb.mxu1 %v148_v57  ;;  %282 = vmatpush.msra.mxu0 %v132_v58  ;;  %v316_v36 = vmul.f32 %v497_v33, %v315_v35 }
  0x36   :  { %265 = vmatpush.msra.mxu3 %v122_v59  ;;  %236 = vmatpush.msrb.mxu2 %v103_v60  ;;  %v411_v49 = vsub.f32 1.0, %v410_v47 }
  0x37   :  { %266 = vmatmul.f32.vlgmr.msra.gmra.mxu3 %v736_v61  ;;  %298 = vmatpush.msrb.mxu1 %v145_v62  ;;  %v317_v37 = vadd.f32 %v497_v33, %v316_v36 }
  0x38   :  { %283 = vmatpush.msra.mxu0 %v129_v63  ;;  %237 = vmatpush.msrb.mxu2 %v100_v0  ;;  %v412_v50 = vmul.f32 %v499_v42, %v411_v49 }
  0x39   :  { %299 = vmatpush.msrb.mxu1 %v142_v1  ;;  %483 = vmatmul.msk.f32.vlgmr.msrb.gmra.mxu2 %vm178_vm0, %v730_v29  ;;  %v174_v29 = vperm.slane %v170_v10, 2  ;;  %v319_v39 = vsel %vm318_vm1, %v497_v33, %v317_v37 }
  0x3a   :  { %284 = vmatpush.msra.mxu0 %v126_v2  ;;  %v413_v53 = vadd.f32 %v499_v42, %v412_v50 }
  0x3b   :  { %300 = vmatpush.msrb.mxu1 %v139_v3 }
  0x3c   :  { %285 = vmatpush.msra.mxu0 %v123_v4  ;;  %v415_v56 = vsel %vm414_vm2, %v499_v42, %v413_v53 }
  0x3d   :  { %286 = vmatmul.f32.vlgmr.msra.gmra.mxu0 %v736_v61  ;;  %301 = vmatpush.msrb.mxu1 %v136_v5 }
  0x3f   :  { %302 = vmatpush.msrb.mxu1 %v133_v6 }
  0x41   :  { %303 = vmatpush.msrb.mxu1 %v130_v7 }
  0x43   :  { %304 = vmatpush.msrb.mxu1 %v127_v8 }
  0x45   :  { %305 = vmatpush.msrb.mxu1 %v124_v9 }
  0x46   :  { %306 = vmatmul.f32.vlgmr.msrb.gmra.mxu1 %v736_v61 }
  0xa5   :  { %v219_v12 = vpop.f32.mrf.mxu1 }
  0xa6   :  { %v220_v14 = vadd.f32 %v219_v12, %v173_v11 }
  0xa9   :  { %v199_v15 = vpop.f32.mrf.mxu2 }
  0xaa   :  { %v200_v16 = vadd.f32 %v199_v15, %v172_v13 }
  0xac   :  { %v310_v17 = vadd.f32 %v220_v14, %v200_v16 }
  0xae   :  { %311 = vadd.xlane.f32.xlu0 %v310_v17 }
  0xba   :  { %v267_v21 = vpop.f32.mrf.mxu3  ;;  %v287_v22 = vpop.f32.mrf.mxu0 }
  0xbb   :  { %v268_v23 = vadd.f32 %v267_v21, %v244_v19  ;;  %v288_v24 = vadd.f32 %v287_v22, %v245_v20 }
  0xbc   :  { %v239_v30 = vpop.f32.mrf.mxu2 }
  0xbd   :  { %v342_v25 = vadd.f32 %v288_v24, %v268_v23  ;;  %v240_v31 = vadd.f32 %v239_v30, %v174_v29 }
  0xbf   :  { %343 = vadd.xlane.f32.xlu0 %v342_v25 }
  0xc3   :  { %v307_v27 = vpop.f32.mrf.mxu1 }
  0xc4   :  { %v308_v28 = vadd.f32 %v307_v27, %v246_v26 }
  0xc6   :  { %434 = vadd.xlane.f32.xlu1 %v308_v28 }
  0xce   :  { %407 = vadd.xlane.f32.xlu1 %v240_v31 }
 0x121   :  { %v312_v40 = vpop.xlane.xlu0 %311 }
 0x122   :  { %v320_v41 = vmul.f32 %v319_v39, %v312_v40 }
 0x124   :  { %v746_v43 = vsub.f32 %v200_v16, %v320_v41  ;;  %v748_v44 = vsub.f32 %v220_v14, %v320_v41 }
 0x126   :  { %v323_v45 = vmul.f32 %v746_v43, %v746_v43  ;;  %v324_v46 = vmul.f32 %v748_v44, %v748_v44 }
 0x128   :  { %v325_v48 = vadd.f32 %v324_v46, %v323_v45 }
 0x12a   :  { %326 = vadd.xlane.f32.xlu2 %v325_v48 }
 0x132   :  { %v344_v51 = vpop.xlane.xlu0 %343 }
 0x133   :  { %v345_v52 = vmul.f32 %v344_v51, %v319_v39 }
 0x135   :  { %v346_v54 = vsub.f32 %v268_v23, %v345_v52  ;;  %v347_v55 = vsub.f32 %v288_v24, %v345_v52 }
 0x137   :  { %v348_v57 = vmul.f32 %v346_v54, %v346_v54  ;;  %v349_v58 = vmul.f32 %v347_v55, %v347_v55 }
 0x139   :  { %v435_v59 = vpop.xlane.xlu1 %434  ;;  %v350_v60 = vadd.f32 %v349_v58, %v348_v57 }
 0x13a   :  { %v436_v62 = vmul.f32 %v435_v59, %v415_v56 }
 0x13b   :  { %351 = vadd.xlane.f32.xlu2 %v350_v60 }
 0x13c   :  { %v754_v63 = vsub.f32 %v308_v28, %v436_v62 }
 0x13e   :  { %v438_v0 = vmul.f32 %v754_v63, %v754_v63 }
 0x140   :  { %439 = vadd.xlane.f32.xlu0 %v438_v0 }
 0x141   :  { %v408_v1 = vpop.xlane.xlu1 %407 }
 0x142   :  { %v416_v2 = vmul.f32 %v415_v56, %v408_v1 }
 0x144   :  { %v758_v3 = vsub.f32 %v240_v31, %v416_v2 }
 0x146   :  { %v418_v4 = vmul.f32 %v758_v3, %v758_v3 }
 0x148   :  { %419 = vadd.xlane.f32.xlu1 %v418_v4 }
 0x19d   :  { %v327_v5 = vpop.xlane.xlu2 %326 }
 0x19e   :  { %v328_v6 = vmul.f32 %v327_v5, %v319_v39 }
 0x1a0   :  { %v329_v7 = vadd.f32 1e-05, %v328_v6 }
 0x1a2   :  { %500 = vrsqrt.f32 %v329_v7  ;;  %vm336_vm4 = vweird.f32 %v329_v7 }
 0x1a8   :  { %v501_v8 = vpop.eup %500 }
 0x1a9   :  { %v331_v9 = vmul.f32 %v501_v8, %v329_v7  ;;  %vm337_vm3 = vweird.f32 %v501_v8 }
 0x1aa   :  { %vm338_vm5 = vmor %vm336_vm4, %vm337_vm3 }
 0x1ab   :  { %v332_v12 = vmul.f32 %v501_v8, %v331_v9 }
 0x1ad   :  { %v333_v14 = vmul.f32 0.5, %v332_v12 }
 0x1ae   :  { %v352_v10 = vpop.xlane.xlu2 %351 }
 0x1af   :  { %v353_v11 = vmul.f32 %v352_v10, %v319_v39  ;;  %v334_v17 = vsub.f32 1.5, %v333_v14 }
 0x1b1   :  { %v354_v13 = vadd.f32 1e-05, %v353_v11  ;;  %v335_v22 = vmul.f32 %v501_v8, %v334_v17 }
 0x1b3   :  { %502 = vrsqrt.f32 %v354_v13  ;;  %v440_v15 = vpop.xlane.xlu0 %439  ;;  %v339_v27 = vsel %vm338_vm5, %v501_v8, %v335_v22  ;;  %vm361_vm7 = vweird.f32 %v354_v13 }
 0x1b4   :  { %v441_v19 = vmul.f32 %v440_v15, %v415_v56  ;;  %v340_v30 = vmul.f32 %v339_v27, %v746_v43  ;;  %v341_v32 = vmul.f32 %v339_v27, %v748_v44 }
 0x1b6   :  { %v442_v25 = vadd.f32 1e-05, %v441_v19 }
 0x1b8   :  { %504 = vrsqrt.f32 %v442_v25  ;;  %vm449_vm10 = vweird.f32 %v442_v25 }
 0x1b9   :  { %v503_v16 = vpop.eup %502 }
 0x1ba   :  { %v356_v18 = vmul.f32 %v503_v16, %v354_v13  ;;  %vm362_vm6 = vweird.f32 %v503_v16 }
 0x1bb   :  { %v420_v20 = vpop.xlane.xlu1 %419  ;;  %vm363_vm8 = vmor %vm361_vm7, %vm362_vm6 }
 0x1bc   :  { %v357_v21 = vmul.f32 %v503_v16, %v356_v18  ;;  %v421_v23 = vmul.f32 %v420_v20, %v415_v56 }
 0x1be   :  { %v358_v24 = vmul.f32 0.5, %v357_v21  ;;  %v422_v28 = vadd.f32 1e-05, %v421_v23  ;;  %v505_v37 = vpop.eup %504 }
 0x1bf   :  { %v444_v41 = vmul.f32 %v505_v37, %v442_v25  ;;  %vm450_vm9 = vweird.f32 %v505_v37 }
 0x1c0   :  { %v359_v26 = vsub.f32 1.5, %v358_v24  ;;  %506 = vrsqrt.f32 %v422_v28  ;;  %vm451_vm13 = vmor %vm449_vm10, %vm450_vm9  ;;  %vm429_vm14 = vweird.f32 %v422_v28 }
 0x1c1   :  { %v445_v45 = vmul.f32 %v505_v37, %v444_v41 }
 0x1c2   :  { %v360_v29 = vmul.f32 %v503_v16, %v359_v26 }
 0x1c3   :  { %v446_v44 = vmul.f32 0.5, %v445_v45 }
 0x1c4   :  { %v364_v31 = vsel %vm363_vm8, %v503_v16, %v360_v29 }
 0x1c5   :  { %v365_v33 = vmul.f32 %v364_v31, %v346_v54  ;;  %v366_v34 = vmul.f32 %v364_v31, %v347_v55  ;;  %v447_v51 = vsub.f32 1.5, %v446_v44 }
 0x1c6   :  { %v507_v40 = vpop.eup %506 }
 0x1c7   :  { %v367_v35 = vadd.f32 %v365_v33, %v340_v30  ;;  %v368_v36 = vadd.f32 %v366_v34, %v341_v32  ;;  %v424_v42 = vmul.f32 %v507_v40, %v422_v28  ;;  %v448_v56 = vmul.f32 %v505_v37, %v447_v51 }
 0x1c8   :  { %vm430_vm11 = vweird.f32 %v507_v40 }
 0x1c9   :  { %v484_v38 = vmul.f32 -1.442695, %v367_v35  ;;  %v485_v39 = vmul.f32 -1.442695, %v368_v36  ;;  %v425_v48 = vmul.f32 %v507_v40, %v424_v42  ;;  %v452_v2 = vsel %vm451_vm13, %v505_v37, %v448_v56  ;;  %vm431_vm0 = vmor %vm429_vm14, %vm430_vm11 }
 0x1ca   :  { %v453_v9 = vmul.f32 %v452_v2, %v754_v63 }
 0x1cb   :  { %508 = vpow2.f32 %v484_v38  ;;  %v426_v50 = vmul.f32 0.5, %v425_v48 }
 0x1cc   :  { %510 = vpow2.f32 %v485_v39 }
 0x1cd   :  { %v427_v53 = vsub.f32 1.5, %v426_v50 }
 0x1cf   :  { %v428_v60 = vmul.f32 %v507_v40, %v427_v53 }
 0x1d1   :  { %v509_v46 = vpop.eup %508  ;;  %v432_v7 = vsel %vm431_vm0, %v507_v40, %v428_v60 }
 0x1d2   :  { %v511_v47 = vpop.eup %510  ;;  %v375_v43 = vadd.f32 1.0, %v509_v46  ;;  %v433_v13 = vmul.f32 %v432_v7, %v758_v3 }
 0x1d3   :  { %v376_v49 = vadd.f32 1.0, %v511_v47 }
 0x1d4   :  { %512 = vrcp.f32 %v375_v43  ;;  %v388_v59 = vand.u32 2147483648, %v375_v43  ;;  %v386_v1 = vand.u32 2147483647, %v375_v43  ;;  %vm382_vm15 = vweird.f32 %v375_v43 }
 0x1d5   :  { %514 = vrcp.f32 %v376_v49  ;;  %v403_v14 = vand.u32 2147483648, %v376_v49  ;;  %vm397_vm4 = vweird.f32 %v376_v49  ;;  %v401_v15 = vand.u32 2147483647, %v376_v49 }
 0x1d6   :  { %v389_v6 = vor.u32 1.1754944e-38, %v388_v59  ;;  %vm387_vm2 = vcmp.eq.f32.partialorder %v386_v1, 8.507059e+37 }
 0x1d7   :  { %v404_v18 = vor.u32 1.1754944e-38, %v403_v14  ;;  %vm402_vm6 = vcmp.eq.f32.partialorder %v401_v15, 8.507059e+37 }
 0x1da   :  { %v513_v52 = vpop.eup %512 }
 0x1db   :  { %v515_v54 = vpop.eup %514  ;;  %v378_v55 = vmul.f32 %v513_v52, %v375_v43  ;;  %vm383_vm12 = vweird.f32 %v513_v52 }
 0x1dc   :  { %v393_v57 = vmul.f32 %v515_v54, %v376_v49  ;;  %vm384_vm1 = vmor %vm382_vm15, %vm383_vm12  ;;  %vm398_vm3 = vweird.f32 %v515_v54 }
 0x1dd   :  { %v379_v58 = vsub.f32 1.0, %v378_v55  ;;  %vm399_vm5 = vmor %vm397_vm4, %vm398_vm3 }
 0x1de   :  { %v394_v62 = vsub.f32 1.0, %v393_v57 }
 0x1df   :  { %v380_v0 = vmul.f32 %v513_v52, %v379_v58 }
 0x1e0   :  { %v395_v4 = vmul.f32 %v515_v54, %v394_v62 }
 0x1e1   :  { %v381_v5 = vadd.f32 %v513_v52, %v380_v0 }
 0x1e2   :  { %v396_v11 = vadd.f32 %v515_v54, %v395_v4 }
 0x1e3   :  { %v385_v8 = vsel %vm384_vm1, %v513_v52, %v381_v5 }
 0x1e4   :  { %v390_v10 = vsel %vm387_vm2, %v389_v6, %v385_v8  ;;  %v400_v17 = vsel %vm399_vm5, %v515_v54, %v396_v11 }
 0x1e5   :  { %v454_v12 = vmul.f32 %v453_v9, %v390_v10  ;;  %v405_v19 = vsel %vm402_vm6, %v404_v18, %v400_v17 }
 0x1e6   :  { %v458_v20 = vsub.f32 1.0, %v405_v19  ;;  %v457_v63 = vmul.f32 %v405_v19, %v736_v61 }
 0x1e7   :  { %v455_v16 = vadd.f32 %v454_v12, %v433_v13 }
 0x1e9   :  { %516 = vtanh.f32 %v455_v16 }
 0x1ef   :  { %v517_v21 = vpop.eup %516 }
 0x1f0   :  { %v459_v3 = vmul.f32 %v517_v21, %v458_v20 }
 0x1f2   :  { %v460_v22 = vadd.f32 %v459_v3, %v457_v63 }
 0x1f4   :  { %461 = vst [vmem:[#allocation11] sm:$0xff] %v460_v22 }
 0x1f5   :  { %472 = dma.vmem_to_hbm [thread:$0]  %s468_s21, 128, %s470_s24, [#allocation4]  }
 0x1f6   :  { %668 = dma.done.wait [#allocation4], 128  }
 0x1f7   :  { %669 = vsyncadd [#allocation4], 4294967168 }
 0x1f8   :  { %477 = vsyncpa [#allocation3], 1 }
 0x1f9   :  { %478 = vsyncpa [#allocation6], 1 }
 0x1fa   :  { %479 = vsyncpa [#allocation9], 1 }
 0x1fb   :  { %480 = vsyncpa [#allocation4], 1 }

</bundles_post_ra>
